<compile_context>
chip_gen: v7x
topology: tpu7x:2x2x1
jax: 0.10.0
libtpu: 0.0.40
codegen_flags: <defaults>
</compile_context>

<pallas_src>
import functools

import jax
import jax.numpy as jnp
from jax import lax
from jax.experimental import pallas as pl
from jax.experimental.pallas import tpu as pltpu

# Constants from the PyTorch forward pass:
#   out = (1.8691 - 0.06231)/2 * sin(out) - (1.8691 + 0.06231)/2
_SIN_SCALE = (1.8691 - 0.06231) / 2.0
_SIN_SHIFT = (1.8691 + 0.06231) / 2.0

_TB_MAX = 64 * 1024   # max batch lanes per grid step (multiple of _CHUNK); sweep 32K-128K
_CHUNK = 2048         # inner-loop lane chunk: bounds the (Hpad, chunk) intermediate


def _round_up(x, m):
    return ((x + m - 1) // m) * m


def datadriven_kernel(xT_ref, w1_ref, b1_ref, w2_ref, b2_ref, o_ref, *, chunk):
    hpad, _ = w1_ref.shape
    tb = xT_ref.shape[1]
    n_chunks = tb // chunk

    # Grid-invariant loads + broadcasts hoisted out of the chunk loop
    # (JAX does not CSE broadcast_in_dim; per-iteration broadcasts would
    # add redundant VPU/XLU work every chunk).
    w1 = w1_ref[...]                                     # (Hpad, in)
    b1_b = jnp.broadcast_to(b1_ref[...], (hpad, chunk))  # (Hpad, chunk)
    w2_b = jnp.broadcast_to(w2_ref[...], (hpad, chunk))  # (Hpad, chunk)
    b2 = b2_ref[0]                                       # SMEM scalar

    def body(c, carry):
        off = pl.multiple_of(c * chunk, chunk)
        x_c = xT_ref[:, pl.ds(off, chunk)]                            # (in, chunk)
        # fc1 on the MXU: (Hpad, in) @ (in, chunk) -> (Hpad, chunk), f32 acc.
        h = jnp.dot(w1, x_c, preferred_element_type=jnp.float32)
        h = jnp.maximum(h + b1_b, 0.0)                                # bias + ReLU (VPU)
        # fc2 with out_size == 1: VPU multiply + sublane (XLU) reduction.
        y = jnp.sum(w2_b * h, axis=0, keepdims=True) + b2             # (1, chunk)
        # Epilogue: scale * sin(y) - shift (EUP/VPU), lane-dense store.
        o_ref[:, pl.ds(off, chunk)] = (
            _SIN_SCALE * jnp.sin(y) - _SIN_SHIFT).astype(o_ref.dtype)
        return carry

    lax.fori_loop(0, n_chunks, body, 0)


def prepare_params(w1, b1, w2, b2):
    """One-time parameter prep (hoisted out of the per-call forward path).

    PyTorch nn.Linear layout in:
      w1: (hidden, in), b1: (hidden,), w2: (1, hidden), b2: (1,)
    Returns kernel-ready, hidden-padded tensors:
      w1p: (Hpad, in), b1p: (Hpad, 1), w2p: (Hpad, 1), b2p: (1,)
    Zero padding of the hidden axis is exact: padded rows give relu(0)=0 and
    their w2 entries are 0, so they contribute nothing.
    """
    hidden, in_size = w1.shape
    assert w2.shape == (1, hidden), "this kernel specializes output_size == 1"
    hpad = _round_up(hidden, 8)  # sublane-aligned hidden
    w1p = jnp.zeros((hpad, in_size), jnp.float32).at[:hidden, :].set(w1)
    b1p = jnp.zeros((hpad, 1), jnp.float32).at[:hidden, 0].set(b1)
    w2p = jnp.zeros((hpad, 1), jnp.float32).at[:hidden, 0].set(w2[0])
    b2p = jnp.asarray(b2, jnp.float32).reshape((1,))
    return w1p, b1p, w2p, b2p


def _forward_xt(x_t, w1p, b1p, w2p, b2p):
    """Core path. x_t: (input_size, B) f32, feature-major. Returns (1, B_pad)."""
    in_size, batch = x_t.shape
    hpad = w1p.shape[0]

    # Small-batch cap + big-batch tile (all multiples of 128; tb % chunk == 0).
    if batch <= _CHUNK:
        tb = max(128, _round_up(batch, 128))
        chunk = tb
    else:
        tb = min(_TB_MAX, _round_up(batch, _CHUNK))
        chunk = _CHUNK

    num_blocks = pl.cdiv(batch, tb)
    b_pad = num_blocks * tb
    if b_pad != batch:
        # Pad only the final partial block; padded lanes are computed (on
        # zeros) and sliced off by the caller.
        x_t = jnp.pad(x_t, ((0, 0), (0, b_pad - batch)))

    kernel = functools.partial(datadriven_kernel, chunk=chunk)
    out = pl.pallas_call(
        kernel,
        out_shape=jax.ShapeDtypeStruct((1, b_pad), jnp.float32),
        grid=(num_blocks,),
        in_specs=[
            pl.BlockSpec((in_size, tb), lambda i: (0, i)),    # x.T, pipelined
            pl.BlockSpec((hpad, in_size), lambda i: (0, 0)),  # w1, resident
            pl.BlockSpec((hpad, 1), lambda i: (0, 0)),        # b1, resident
            pl.BlockSpec((hpad, 1), lambda i: (0, 0)),        # w2, resident
            pl.BlockSpec(memory_space=pltpu.MemorySpace.SMEM),  # b2 scalar
        ],
        out_specs=pl.BlockSpec((1, tb), lambda i: (0, i)),    # lane-dense out
        compiler_params=pltpu.CompilerParams(
            # Batch axis is embarrassingly parallel (v7x dual-TC friendly).
            # TODO(synk): if xprof shows one TC busy on v7x, switch this axis
            # to pltpu.CORE_PARALLEL.
            dimension_semantics=("parallel",),
            # Explicit scoped-VMEM budget (raises v5e's 16 MiB default, safe
            # on v6e/v7x); footprint with chunking is only ~40*tb bytes.
            vmem_limit_bytes=32 * 1024 * 1024,
        ),
    )(x_t, w1p, b1p, w2p, b2p)
    return out


@jax.jit
def datadriven_forward(x, w1p, b1p, w2p, b2p):
    """x: (B, input_size) f32. Params as produced by prepare_params().

    Prefer datadriven_forward_xt (feature-major x) upstream to skip the
    transpose relayout entirely; here transpose+cast is one fused XLA pass
    and padding happens only when B is not a tile multiple.
    """
    batch = x.shape[0]
    out = _forward_xt(x.T.astype(jnp.float32), w1p, b1p, w2p, b2p)
    return out[0, :batch][:, None]


@jax.jit
def datadriven_forward_xt(x_t, w1p, b1p, w2p, b2p):
    """x_t: (input_size, B) f32 feature-major — zero-relayout fast path."""
    batch = x_t.shape[1]
    out = _forward_xt(x_t.astype(jnp.float32), w1p, b1p, w2p, b2p)
    return out[0, :batch][:, None]


def init_params(key, input_size, hidden_size, output_size):
    """Matches DataDriven.initialize_weights(): weights ~ N(0, 0.1), biases 0."""
    k1, k2 = jax.random.split(key)
    w1 = 0.1 * jax.random.normal(k1, (hidden_size, input_size), dtype=jnp.float32)
    b1 = jnp.zeros((hidden_size,), dtype=jnp.float32)
    w2 = 0.1 * jax.random.normal(k2, (output_size, hidden_size), dtype=jnp.float32)
    b2 = jnp.zeros((output_size,), dtype=jnp.float32)
    return w1, b1, w2, b2


def _reference(x, w1, b1, w2, b2):
    h = jnp.maximum(x @ w1.T + b1, 0.0)
    y = h @ w2.T + b2
    return _SIN_SCALE * jnp.sin(y) - _SIN_SHIFT


if __name__ == "__main__":
    input_size = 4
    hidden_size = 22
    output_size = 1

    key = jax.random.PRNGKey(0)
    kx, kx2, kp = jax.random.split(key, 3)
    w1, b1, w2, b2 = init_params(kp, input_size, hidden_size, output_size)

    # One-time param prep (hoisted transposes / padding).
    w1p, b1p, w2p, b2p = prepare_params(w1, b1, w2, b2)

    # Small batch (exercises the small-batch tile cap, single chunk).
    batch = 8
    x = jax.random.normal(kx, (batch, input_size), dtype=jnp.float32)
    out = jax.block_until_ready(datadriven_forward(x, w1p, b1p, w2p, b2p))
    ref = _reference(x, w1, b1, w2, b2)
    assert out.shape == (batch, output_size)
    assert jnp.allclose(out, ref, atol=1e-5), "mismatch vs reference (small batch)"

    # Larger batch (exercises the inner chunk loop + partial-block padding),
    # using the feature-major zero-relayout entry point.
    batch2 = 2240
    x2 = jax.random.normal(kx2, (batch2, input_size), dtype=jnp.float32)
    out2 = jax.block_until_ready(
        datadriven_forward_xt(x2.T, w1p, b1p, w2p, b2p))
    ref2 = _reference(x2, w1, b1, w2, b2)
    assert out2.shape == (batch2, output_size)
    assert jnp.allclose(out2, ref2, atol=1e-5), "mismatch vs reference (chunked)"

    print("KERNEL_OK")
</pallas_src>

<mosaic_0001>
module attributes {stable_mosaic.version = 11 : i64} {
  func.func @datadriven_kernel(%arg0: i32, %arg1: memref<4x128xf32, #tpu.memory_space<vmem>>, %arg2: memref<24x4xf32, #tpu.memory_space<vmem>>, %arg3: memref<24x1xf32, #tpu.memory_space<vmem>>, %arg4: memref<24x1xf32, #tpu.memory_space<vmem>>, %arg5: memref<1xf32, #tpu.memory_space<smem>>, %arg6: memref<1x128xf32, #tpu.memory_space<vmem>>) attributes {dimension_semantics = [#tpu.dimension_semantics<parallel>], iteration_bounds = array<i64: 1>, scalar_prefetch = 0 : i64, scratch_operands = 0 : i64, tpu.core_type = #tpu.core_type<tc>, window_params = [{transform_indices = @transform_0, window_bounds = array<i64: 4, 128>}, {pipeline_mode = #tpu.pipeline_mode<synchronous>, transform_indices = @transform_1, window_bounds = array<i64: 24, 4>}, {pipeline_mode = #tpu.pipeline_mode<synchronous>, transform_indices = @transform_2, window_bounds = array<i64: 24, 1>}, {pipeline_mode = #tpu.pipeline_mode<synchronous>, transform_indices = @transform_3, window_bounds = array<i64: 24, 1>}, {transform_indices = @transform_4, window_bounds = array<i64: 1>}, {transform_indices = @transform_5, window_bounds = array<i64: 1, 128>}]} {
    %c0 = arith.constant 0 : index
    %c0_0 = arith.constant 0 : index
    %0 = vector.load %arg2[%c0, %c0_0] : memref<24x4xf32, #tpu.memory_space<vmem>>, vector<24x4xf32>
    %c0_1 = arith.constant 0 : index
    %c0_2 = arith.constant 0 : index
    %1 = vector.load %arg3[%c0_1, %c0_2] : memref<24x1xf32, #tpu.memory_space<vmem>>, vector<24x1xf32>
    %2 = vector.shape_cast %1 : vector<24x1xf32> to vector<24x1xf32>
    %3 = vector.broadcast %2 : vector<24x1xf32> to vector<24x128xf32>
    %c0_3 = arith.constant 0 : index
    %c0_4 = arith.constant 0 : index
    %4 = vector.load %arg4[%c0_3, %c0_4] : memref<24x1xf32, #tpu.memory_space<vmem>>, vector<24x1xf32>
    %5 = vector.shape_cast %4 : vector<24x1xf32> to vector<24x1xf32>
    %6 = vector.broadcast %5 : vector<24x1xf32> to vector<24x128xf32>
    %c0_5 = arith.constant 0 : index
    %7 = memref.load %arg5[%c0_5] : memref<1xf32, #tpu.memory_space<smem>>
    %c0_i32 = arith.constant 0 : i32
    %c128_i32 = arith.constant 128 : i32
    %8 = arith.muli %c0_i32, %c128_i32 : i32
    %9 = tpu.assume_multiple %8, 128 : i32
    %c0_6 = arith.constant 0 : index
    %10 = arith.index_cast %9 : i32 to index
    %11 = vector.load %arg1[%c0_6, %10] : memref<4x128xf32, #tpu.memory_space<vmem>>, vector<4x128xf32>
    %cst = arith.constant dense<0.000000e+00> : vector<24x128xf32>
    %12 = tpu.matmul %0, %11, %cst {dimension_numbers = #tpu.dot_dimension_numbers<[1], [0], [0], [1], [0, 0, 1, 1], [], []>} : vector<24x4xf32>, vector<4x128xf32>, vector<24x128xf32> -> vector<24x128xf32>
    %13 = arith.addf %12, %3 : vector<24x128xf32>
    %cst_7 = arith.constant 0.000000e+00 : f32
    %14 = vector.broadcast %cst_7 : f32 to vector<24x128xf32>
    %15 = arith.maximumf %13, %14 : vector<24x128xf32>
    %16 = arith.mulf %6, %15 : vector<24x128xf32>
    %cst_8 = arith.constant dense<0.000000e+00> : vector<128xf32>
    %17 = vector.multi_reduction <add>, %16, %cst_8 [0] : vector<24x128xf32> to vector<128xf32>
    %18 = vector.shape_cast %17 : vector<128xf32> to vector<1x128xf32>
    %19 = vector.broadcast %7 : f32 to vector<1x128xf32>
    %20 = arith.addf %18, %19 : vector<1x128xf32>
    %21 = math.sin %20 : vector<1x128xf32>
    %cst_9 = arith.constant 0.903394997 : f32
    %22 = vector.broadcast %cst_9 : f32 to vector<1x128xf32>
    %23 = arith.mulf %22, %21 : vector<1x128xf32>
    %cst_10 = arith.constant 0.965704977 : f32
    %24 = vector.broadcast %cst_10 : f32 to vector<1x128xf32>
    %25 = arith.subf %23, %24 : vector<1x128xf32>
    %c0_11 = arith.constant 0 : index
    %26 = arith.index_cast %9 : i32 to index
    %27 = vector.load %arg6[%c0_11, %26] : memref<1x128xf32, #tpu.memory_space<vmem>>, vector<1x128xf32>
    tpu.vector_store %arg6[%c0_11, %26], %25 {strides = array<i32>} : memref<1x128xf32, #tpu.memory_space<vmem>>, vector<1x128xf32>,
    %c1_i32 = arith.constant 1 : i32
    return
  }
  func.func @transform_0(%arg0: i32) -> (i32, i32) {
    %c0_i32 = arith.constant 0 : i32
    %c0_i32_0 = arith.constant 0 : i32
    return %c0_i32, %arg0 : i32, i32
  }
  func.func @transform_1(%arg0: i32) -> (i32, i32) {
    %c0_i32 = arith.constant 0 : i32
    %c0_i32_0 = arith.constant 0 : i32
    %c0_i32_1 = arith.constant 0 : i32
    return %c0_i32, %c0_i32_0 : i32, i32
  }
  func.func @transform_2(%arg0: i32) -> (i32, i32) {
    %c0_i32 = arith.constant 0 : i32
    %c0_i32_0 = arith.constant 0 : i32
    %c0_i32_1 = arith.constant 0 : i32
    return %c0_i32, %c0_i32_0 : i32, i32
  }
  func.func @transform_3(%arg0: i32) -> (i32, i32) {
    %c0_i32 = arith.constant 0 : i32
    %c0_i32_0 = arith.constant 0 : i32
    %c0_i32_1 = arith.constant 0 : i32
    return %c0_i32, %c0_i32_0 : i32, i32
  }
  func.func @transform_4(%arg0: i32) -> i32 {
    %c0_i32 = arith.constant 0 : i32
    %c0_i32_0 = arith.constant 0 : i32
    return %c0_i32 : i32
  }
  func.func @transform_5(%arg0: i32) -> (i32, i32) {
    %c0_i32 = arith.constant 0 : i32
    %c0_i32_0 = arith.constant 0 : i32
    return %c0_i32, %arg0 : i32, i32
  }
}

</mosaic_0001>

<bundles_post_ra>
// kernel: datadriven_forward.1
= control target key start
LH: loop header
LB: loop body
LE: loop exit
PB: predicated region body
PF: predicated region fallthrough
CT: control target
= control target key end

     0   :  { %vm72_vm0 = vcmask 1043456   ;;  %v328_v0 = vmov 0.0   ;;  %vm62_vm1 = vcmask 31744   ;;  %vm329_vm2 = vmmov 0   ;;  %s427_s0 = inlined_call_operand.vmem [shape: f32[4,128], index: 0, kind: input, shape index: {}]   ;;  %s428_s1 = inlined_call_operand.vmem [shape: f32[24,4], index: 1, kind: input, shape index: {}]   ;;  %s429_s2 = inlined_call_operand.vmem [shape: f32[24,1], index: 2, kind: input, shape index: {}]   ;;  %s430_s3 = inlined_call_operand.vmem [shape: f32[24,1], index: 3, kind: input, shape index: {}]   ;;  %s431_s4 = inlined_call_operand.<no memory space> [shape: f32[1], index: 4, kind: input, shape index: {}]   ;;  %s432_s5 = inlined_call_operand.vmem [shape: f32[1,128], index: 5, kind: output, shape index: {}]  }
   0x1   :  { %296 = vmatprep.subr.mxu0 %v328_v0  ;;  %307 = vmatprep.subr.mxu1 %v328_v0  ;;  %v61_v1 = vld [vmem:[%s427_s0] sm:$0xf]  ;;  %v22_v3 = vld [vmem:[%s428_s1 + $0x8] sm:$0xff]  ;;  %v26_v5 = vld [vmem:[%s429_s2 + $0x10] sm:$0xff]  ;;  %v330_v7 = vmov 0   ;;  %v170_v40 = vstv %s431_s4 }
   0x2   :  { %v21_v2 = vld [vmem:[%s428_s1] sm:$0xff]  ;;  %297 = vmatpush3.msk.msra.mxu0 %vm72_vm0, %v61_v1  ;;  %308 = vmatpush3.msk.msra.mxu1 %vm72_vm0, %v61_v1  ;;  %v23_v6 = vld [vmem:[%s428_s1 + $0x10] sm:$0xff]  ;;  %v25_v8 = vld [vmem:[%s429_s2 + $0x8] sm:$0xff]  ;;  %v331_v53 = vmov 683565275  }
   0x3   :  { %298 = vmatprep.mubr.msk.f32.mxu0 %vm329_vm2, %v328_v0  ;;  %301 = vmatprep.mubr.msk.f32.mxu1 %vm329_vm2, %v328_v0  ;;  %v24_v4 = vld [vmem:[%s429_s2] sm:$0xff]  ;;  %v43_v10 = vld [vmem:[%s430_s3 + $0x8] sm:$0xff]  ;;  %v44_v11 = vld [vmem:[%s430_s3 + $0x10] sm:$0xff]  ;;  %v332_v55 = vmov 2475754826  }
   0x4   :  { %299 = vmatmul.mubr.msk.f32.vlgmr.msra.gmra.mrb[0].mxu0 %vm62_vm1, %v21_v2  ;;  %302 = vmatmul.mubr.msk.f32.vlgmr.msra.gmra.mrb[0].mxu1 %vm62_vm1, %v22_v3  ;;  %v42_v9 = vld [vmem:[%s430_s3] sm:$0xff]  ;;  %v333_v58 = vmov 2131351028   ;;  %v334_v61 = vmov 2102212464  }
   0x5   :  { %304 = vmatprep.mubr.msk.f32.mxu1 %vm329_vm2, %v328_v0  ;;  %322 = vset.pattern.permute.xlu0 %v330_v7  ;;  %v335_v0 = vmov 920167782   ;;  %v336_v3 = vmov 1326507024  }
   0x6   :  { %29 = vperm.xlu0 %322, %v24_v4   ;;  %323 = vset.pattern.permute.xlu1 %v330_v7 }
   0x7   :  { %39 = vperm.xlu1 %323, %v26_v5  }
   0x8   :  { %305 = vmatmul.mubr.msk.f32.gmra.mrb[2].mxu1 %vm62_vm1, %v23_v6 }
   0xa   :  { %34 = vperm.xlu0 %322, %v25_v8  }
   0xb   :  { %47 = vperm.xlu1 %323, %v42_v9  }
   0xe   :  { %52 = vperm.xlu0 %322, %v43_v10  }
   0xf   :  { %57 = vperm.xlu1 %323, %v44_v11  }
  0x85   :  { %v30_v12 = vpop.permute.xlu0 %29 }
  0x86   :  { %v40_v13 = vpop.permute.xlu1 %39 }
  0x89   :  { %v35_v14 = vpop.permute.xlu0 %34 }
  0x8a   :  { %v48_v21 = vpop.permute.xlu1 %47 }
  0x8d   :  { %v53_v24 = vpop.permute.xlu0 %52 }
  0x8e   :  { %v58_v32 = vpop.permute.xlu1 %57 }
  0xd7   :  { %v142_v15 = vpop.f32.mrb[0].mxu0  ;;  %v147_v16 = vpop.f32.mrb[0].mxu1 }
  0xd8   :  { %v143_v17 = vadd.f32 %v142_v15, %v30_v12  ;;  %v148_v18 = vadd.f32 %v147_v16, %v35_v14  ;;  %v303_v19 = vpop.f32.mrb[1].mxu1  ;;  %v300_v20 = vpop.f32.mrb[1].mxu0 }
  0xda   :  { %v156_v22 = vmax.f32 %v143_v17, 0.0  ;;  %v157_v23 = vmax.f32 %v148_v18, 0.0 }
  0xdb   :  { %v152_v25 = vpop.f32.mrb[2].mxu1 }
  0xdc   :  { %v159_v26 = vmul.f32 %v156_v22, %v48_v21  ;;  %v160_v27 = vmul.f32 %v157_v23, %v53_v24  ;;  %v153_v28 = vadd.f32 %v152_v25, %v40_v13  ;;  %v306_v29 = vpop.f32.mrb[3].mxu1 }
  0xde   :  { %v162_v30 = vadd.f32 %v160_v27, %v159_v26  ;;  %v158_v31 = vmax.f32 %v153_v28, 0.0 }
  0xe0   :  { %v161_v33 = vmul.f32 %v158_v31, %v58_v32 }
  0xe2   :  { %v163_v34 = vadd.f32 %v162_v30, %v161_v33 }
  0xe4   :  { %v164_v35 = vrot.slane %v163_v34, 4 }
  0xe6   :  { %v165_v36 = vadd.f32 %v164_v35, %v163_v34 }
  0xe8   :  { %v166_v37 = vrot.slane %v165_v36, 2 }
  0xea   :  { %v167_v38 = vadd.f32 %v166_v37, %v165_v36 }
  0xec   :  { %v168_v39 = vrot.slane %v167_v38, 1 }
  0xee   :  { %v169_v41 = vadd.f32 %v168_v39, %v167_v38 }
  0xf0   :  { %v403_v42 = vadd.f32 %v170_v40, %v169_v41 }
  0xf2   :  { %v175_v43 = vand.u32 2139095040, %v403_v42  ;;  %v172_v47 = vand.u32 2147483647, %v403_v42  ;;  %vm174_vm10 = vcmp.lt.s32.totalorder %v403_v42, 0  ;;  %vm264_vm15 = vweird.f32 %v403_v42 }
  0xf4   :  { %v176_v44 = vshrl.u32 %v175_v43, 23  ;;  %v179_v50 = vand.u32 8388607, %v172_v47  ;;  %vm173_vm11 = vcmp.le.f32.partialorder %v172_v47, 0.7853982 }
  0xf6   :  { %v287_v45 = vadd.s32 4294967169, %v176_v44  ;;  %v180_v5 = vor.u32 8388608, %v179_v50 }
  0xf8   :  { %v182_v46 = vadd.s32 1, %v287_v45  ;;  %v220_v19 = vshll.u32 %v180_v5, 8 }
  0xfa   :  { %vm183_vm3 = vcmp.gt.s32.totalorder %v182_v46, 0 }
  0xfb   :  { %v184_v48 = vsel %vm183_vm3, %v182_v46, 0 }
  0xfc   :  { %v186_v49 = vand.u32 31, %v184_v48  ;;  %v185_v52 = vshrl.u32 %v184_v48, 5 }
  0xfe   :  { %v187_v51 = vsub.s32 32, %v186_v49  ;;  %v189_v54 = vshll.u32 %v331_v53, %v186_v49  ;;  %v192_v56 = vshll.u32 %v332_v55, %v186_v49  ;;  %v195_v60 = vshll.u32 %v333_v58, %v186_v49 }
  0xff   :  { %v198_v63 = vshll.u32 %v334_v61, %v186_v49  ;;  %v201_v2 = vshll.u32 %v335_v0, %v186_v49  ;;  %vm204_vm4 = vcmp.lt.s32.totalorder %v185_v52, 1  ;;  %vm207_vm5 = vcmp.lt.s32.totalorder %v185_v52, 4 }
 0x100   :  { %v190_v57 = vshrl.u32 %v332_v55, %v187_v51  ;;  %v193_v59 = vshrl.u32 %v333_v58, %v187_v51  ;;  %v196_v62 = vshrl.u32 %v334_v61, %v187_v51  ;;  %v199_v1 = vshrl.u32 %v335_v0, %v187_v51 }
 0x101   :  { %v202_v4 = vshrl.u32 %v336_v3, %v187_v51  ;;  %v188_v14 = vshrl.u32 %v331_v53, %v187_v51  ;;  %vm206_vm6 = vcmp.lt.s32.totalorder %v185_v52, 3  ;;  %vm205_vm7 = vcmp.lt.s32.totalorder %v185_v52, 2 }
 0x102   :  { %v191_v6 = vor.u32 %v190_v57, %v189_v54  ;;  %v194_v7 = vor.u32 %v193_v59, %v192_v56  ;;  %v197_v8 = vor.u32 %v196_v62, %v195_v60  ;;  %v200_v9 = vor.u32 %v199_v1, %v198_v63 }
 0x103   :  { %v203_v10 = vor.u32 %v202_v4, %v201_v2 }
 0x104   :  { %v209_v11 = vsel %vm207_vm5, %v197_v8, 2102212464  ;;  %v212_v12 = vsel %vm204_vm4, %v191_v6, %v194_v7  ;;  %v216_v13 = vsel %vm204_vm4, %v194_v7, %v197_v8  ;;  %v213_v15 = vsel %vm207_vm5, %v200_v9, 920167782 }
 0x105   :  { %v217_v16 = vsel %vm207_vm5, %v203_v10, 1326507024  ;;  %v214_v17 = vsel %vm206_vm6, %v197_v8, %v213_v15  ;;  %v208_v20 = vsel %vm204_vm4, %v188_v14, %v191_v6  ;;  %v210_v21 = vsel %vm206_vm6, %v194_v7, %v209_v11 }
 0x106   :  { %v218_v18 = vsel %vm206_vm6, %v200_v9, %v217_v16  ;;  %v215_v22 = vsel %vm205_vm7, %v212_v12, %v214_v17  ;;  %v211_v28 = vsel %vm205_vm7, %v208_v20, %v210_v21 }
 0x107   :  { %v219_v23 = vsel %vm205_vm7, %v216_v13, %v218_v18  ;;  %v412_v26 = vmul.u32.u64.low %v220_v19, %v215_v22  ;;  %v413_v27 = vmul.u32.u64.high %v220_v19, %v215_v22, %v412_v26  ;;  %v227_v30 = vmul.u32 %v220_v19, %v211_v28 }
 0x108   :  { %v409_v24 = vmul.u32.u64.low %v220_v19, %v219_v23  ;;  %v410_v25 = vmul.u32.u64.high %v220_v19, %v219_v23, %v409_v24 }
 0x109   :  { %v230_v29 = vadd.s32 1, %v413_v27 }
 0x10a   :  { %vm229_vm8 = vc.u32 %v410_v25, %v412_v26  ;;  %v228_v43 = vadd.s32 %v412_v26, %v410_v25 }
 0x10b   :  { %v231_v31 = vsel %vm229_vm8, %v230_v29, %v413_v27 }
 0x10c   :  { %v232_v32 = vadd.s32 %v231_v31, %v227_v30 }
 0x10e   :  { %v233_v33 = vadd.s32 536870912, %v232_v32 }
 0x110   :  { %v234_v34 = vshrl.u32 %v233_v33, 30 }
 0x112   :  { %v235_v35 = vshll.u32 %v234_v34, 30  ;;  %v258_v56 = vsub.s32 4, %v234_v34 }
 0x114   :  { %v236_v36 = vsub.s32 %v232_v32, %v235_v35  ;;  %v259_v59 = vsel %vm174_vm10, %v258_v56, %v234_v34 }
 0x115   :  { %v261_v61 = vsel %vm173_vm11, 0, %v259_v59 }
 0x116   :  { %v238_v37 = vsub.s32 0, %v236_v36  ;;  %v265_v62 = vadd.s32 3, %v261_v61 }
 0x118   :  { %v288_v38 = vmin.u32 %v238_v37, %v236_v36  ;;  %v266_v63 = vand.u32 3, %v265_v62 }
 0x11a   :  { %v240_v39 = vclz %v288_v38  ;;  %vm271_vm12 = vcmp.eq.s32.totalorder %v266_v63, 2  ;;  %vm268_vm13 = vcmp.eq.s32.totalorder %v266_v63, 0  ;;  %vm267_vm14 = vcmp.lt.s32.totalorder %v266_v63, 2 }
 0x11c   :  { %v289_v40 = vadd.s32 4294967294, %v240_v39 }
 0x11e   :  { %vm290_vm9 = vcmp.lt.s32.totalorder %v289_v40, 0 }
 0x11f   :  { %v243_v41 = vsel %vm290_vm9, 0, %v289_v40 }
 0x120   :  { %v244_v44 = vsub.s32 32, %v243_v41  ;;  %v248_v45 = vsub.s32 4294967266, %v243_v41  ;;  %v245_v46 = vshll.u32 %v236_v36, %v243_v41 }
 0x122   :  { %v246_v48 = vshrl.u32 %v228_v43, %v244_v44  ;;  %v249_v49 = vadd.s32 127, %v248_v45 }
 0x124   :  { %v247_v50 = vor.u32 %v246_v48, %v245_v46  ;;  %v250_v51 = vshll.u32 %v249_v49, 23 }
 0x126   :  { %v251_v52 = vor.u32 4788187, %v250_v51  ;;  %v254_v54 = vcvt.s32.f32 %v247_v50 }
 0x128   :  { %v252_v53 = vand.u32 2147483647, %v251_v52 }
 0x12a   :  { %v255_v55 = vmul.f32 %v254_v54, %v252_v53 }
 0x12c   :  { %v256_v57 = vxor.u32 2147483648, %v255_v55 }
 0x12e   :  { %v257_v58 = vsel %vm174_vm10, %v256_v57, %v255_v55 }
 0x12f   :  { %v260_v60 = vsel %vm173_vm11, %v403_v42, %v257_v58 }
 0x130   :  { %324 = vcosq.f32 %v260_v60 }
 0x131   :  { %326 = vsinq.f32 %v260_v60 }
 0x13a   :  { %v325_v0 = vpop.eup %324 }
 0x13b   :  { %v327_v1 = vpop.eup %326  ;;  %v272_v2 = vxor.u32 2147483648, %v325_v0 }
 0x13c   :  { %v269_v3 = vxor.u32 2147483648, %v327_v1 }
 0x13d   :  { %v273_v4 = vsel %vm271_vm12, %v272_v2, %v327_v1 }
 0x13e   :  { %v270_v5 = vsel %vm268_vm13, %v325_v0, %v269_v3 }
 0x13f   :  { %v274_v47 = vsel %vm267_vm14, %v270_v5, %v273_v4 }
 0x140   :  { %v275_v6 = vsel %vm264_vm15, nan, %v274_v47 }
 0x141   :  { %v276_v7 = vmul.f32 0.903395, %v275_v6 }
 0x143   :  { %v291_v8 = vadd.f32 -0.965705, %v276_v7 }
 0x145   :  { %278 = vst [vmem:[%s432_s5] sm:$0x1] %v291_v8 }

</bundles_post_ra>
